<compile_context>
chip_gen: v7x
topology: tpu7x:2x2x1
jax: 0.10.0
libtpu: 0.0.40
codegen_flags: <defaults>
</compile_context>

<pallas_src>
import jax
import jax.numpy as jnp
from jax.experimental import pallas as pl
from jax.experimental.pallas import tpu as pltpu


def _attention_kernel(hproj_ref, enc_ref, mask_ref, we_ref, v_ref, out_ref):
    """One grid step processes TB batch elements.

    hproj_ref: (TB, Hp)     hidden @ W_hid^T + bias (precomputed, f32, H padded)
    enc_ref:   (TB*S, E2)   flattened encoder outputs for this batch tile
    mask_ref:  (TB, S)      bf16, 1 = valid token, 0 = pad
    we_ref:    (E2, Hp)     W_enc^T, bf16 (shared / resident across grid steps)
    v_ref:     (1, Hp)      score projection row, f32 (shared)
    out_ref:   (TB, S)      softmax attention weights (lane-dense in S)
    """
    TB, S = out_ref.shape
    Hp = we_ref.shape[1]

    # One lane-dense MXU matmul over all TB*S rows of this tile.
    # bf16 x bf16 inputs, f32 accumulation (avoids the multi-pass f32 MXU path).
    enc_bf = enc_ref[...].astype(jnp.bfloat16)
    e_term = jnp.dot(enc_bf, we_ref[...],
                     preferred_element_type=jnp.float32)          # (TB*S, Hp)

    # energy = tanh(enc @ W_enc^T + hidden @ W_hid^T + b); padded H columns are
    # tanh(0) = 0 and v is zero there, so they do not affect the scores.
    energy = jnp.tanh(e_term.reshape(TB, S, Hp)
                      + hproj_ref[...][:, None, :])               # (TB, S, Hp)

    # scores = energy @ v as a VPU multiply + lane reduce over Hp; result is
    # lane-dense (TB, S).  (MXU alternative only pays off if the XLU slot is
    # saturated, which it is not at these sizes.)
    scores = jnp.sum(energy * v_ref[...][None, :, :], axis=-1)    # (TB, S)

    # masked_fill(mask == 0, -1e10)
    mask_f = mask_ref[...].astype(jnp.float32)
    scores = jnp.where(mask_f == 0.0, jnp.float32(-1.0e10), scores)

    # Numerically stable row softmax over S (last / lane axis).
    m = jnp.max(scores, axis=-1, keepdims=True)
    e = jnp.exp(scores - m)
    denom = jnp.sum(e, axis=-1, keepdims=True)
    # approx reciprocal (EUP): rows sum to 1 within ~1e-3; use exact division
    # if a downstream consumer assumes exact normalization.
    out_ref[...] = e * pl.reciprocal(denom, approx=True)


def bahdanau_attention(hidden, encoder_outputs, mask, w_attn, b_attn, v):
    """hidden: (B, H_dec); encoder_outputs: (B, S, 2*H_enc); mask: (B, >=S).

    w_attn: (H_dec, 2*H_enc + H_dec)  -- torch nn.Linear weight layout (out, in)
    b_attn: (H_dec,)
    v:      (1, H_dec)                -- torch nn.Linear(dec_hid, 1, bias=False)
    Returns: (B, S) float32 softmax attention weights.
    """
    encoder_outputs = jnp.asarray(encoder_outputs)
    B, S, E2 = encoder_outputs.shape
    H = hidden.shape[1]

    hidden = jnp.asarray(hidden, jnp.float32)
    w_attn = jnp.asarray(w_attn, jnp.float32)
    b_attn = jnp.asarray(b_attn, jnp.float32)
    v = jnp.asarray(v, jnp.float32).reshape(1, H)

    # torch.cat((hidden, encoder_outputs), dim=2): first H input columns of
    # attn.weight multiply `hidden`, the remaining E2 columns multiply enc.
    wh = w_attn[:, :H]                      # (H, H)
    we_t = jnp.transpose(w_attn[:, H:])     # (E2, H)

    # Hoist the per-batch hidden projection (+bias) into one batched XLA matmul.
    hproj = hidden @ wh.T + b_attn[None, :]     # (B, H) f32

    # Pad H to a multiple of 128 (tiny operands only) for lane-dense vregs and
    # an aligned MXU N-dim.  Padded columns are exact zeros -> scores unchanged.
    Hp = ((H + 127) // 128) * 128
    if Hp != H:
        hproj = jnp.pad(hproj, ((0, 0), (0, Hp - H)))
        we_t = jnp.pad(we_t, ((0, 0), (0, Hp - H)))
        v = jnp.pad(v, ((0, 0), (0, Hp - H)))
    we_bf = we_t.astype(jnp.bfloat16)

    # Mask: slice to S (torch does mask[:, :src_len]), carry as bf16 0/1.
    mask_bf = jnp.asarray(mask)[:, :S].astype(jnp.bfloat16)

    # Encoder stream stays in its caller dtype (bf16 upstream is used as-is;
    # f32 is cast to bf16 inside the kernel only for the MXU inputs).
    enc = encoder_outputs
    enc_isz = jnp.dtype(enc.dtype).itemsize

    # ---- per-generation VMEM budget & batch-tile selection ------------------
    try:
        vmem_cap = int(pltpu.get_tpu_info().vmem_capacity_bytes)
    except Exception:
        vmem_cap = 64 * 1024 * 1024          # conservative (v7x per-TC) fallback
    budget = min(vmem_cap // 2, 48 * 1024 * 1024)

    # Resident (constant index_map) blocks: W_enc^T and v.
    resident = 2 * (E2 * Hp * 2) + 2 * (Hp * 4)
    # Per batch element: double-buffered pipeline blocks + single-buffered f32
    # in-kernel intermediates (e_term, energy, energy*v), which the previous
    # sizing formula ignored.
    per_b = (2 * S * E2 * enc_isz            # enc block
             + 2 * Hp * 4                    # hproj block
             + 2 * S * 2                     # mask block (bf16)
             + 2 * S * 4                     # out block
             + 3 * S * Hp * 4)               # f32 intermediates

    usable = max(int(0.85 * budget) - resident, per_b)
    tb = max(1, usable // per_b)
    if tb >= B:
        TB = B
    else:
        TB = max(8, (tb // 8) * 8)           # 8-aligned when smaller than B
    # Ensure >= 2 grid steps when feasible so v7x's two TensorCores both work.
    if B >= 16:
        TB = min(TB, max(8, 8 * (((B + 1) // 2) // 8)))
    if TB < B:
        # Prefer an 8-aligned divisor of B to avoid a ragged last tile.
        for cand in range(TB, 7, -8):
            if B % cand == 0:
                TB = cand
                break
    TB = min(TB, B)

    num_tiles = pl.cdiv(B, TB)
    est = resident + TB * per_b
    vmem_limit = int(min(max(budget, est + (4 << 20)), vmem_cap - (8 << 20)))

    enc2d = enc.reshape(B * S, E2)           # HBM-level reshape, free

    out = pl.pallas_call(
        _attention_kernel,
        out_shape=jax.ShapeDtypeStruct((B, S), jnp.float32),
        grid_spec=pltpu.PrefetchScalarGridSpec(
            num_scalar_prefetch=0,
            grid=(num_tiles,),
            in_specs=[
                pl.BlockSpec((TB, Hp), lambda b: (b, 0)),        # hproj
                pl.BlockSpec((TB * S, E2), lambda b: (b, 0)),    # enc (flattened)
                pl.BlockSpec((TB, S), lambda b: (b, 0)),         # mask
                pl.BlockSpec((E2, Hp), lambda b: (0, 0)),        # W_enc^T (resident)
                pl.BlockSpec((1, Hp), lambda b: (0, 0)),         # v row (resident)
            ],
            out_specs=pl.BlockSpec((TB, S), lambda b: (b, 0)),
        ),
        compiler_params=pltpu.CompilerParams(
            dimension_semantics=("parallel",),
            vmem_limit_bytes=vmem_limit),
    )(hproj, enc2d, mask_bf, we_bf, v)

    return out


def _reference(hidden, encoder_outputs, mask, w_attn, b_attn, v):
    B, S, _ = encoder_outputs.shape
    h_rep = jnp.repeat(hidden[:, None, :], S, axis=1)
    cat = jnp.concatenate([h_rep, encoder_outputs], axis=2)
    energy = jnp.tanh(cat @ w_attn.T + b_attn)
    attn = (energy @ v.T)[..., 0]
    attn = jnp.where(mask[:, :S] == 0, -1.0e10, attn)
    return jax.nn.softmax(attn, axis=1)


if __name__ == "__main__":
    # Small deterministic problem: batch=2, src_len=8, enc_hid=16, dec_hid=32
    B, S = 2, 8
    enc_hid, dec_hid = 16, 32
    in_feat = 2 * enc_hid + dec_hid

    key = jax.random.PRNGKey(0)
    k_h, k_e, k_w, k_b, k_v = jax.random.split(key, 5)

    hidden = jax.random.normal(k_h, (B, dec_hid), dtype=jnp.float32)
    encoder_outputs = jax.random.normal(k_e, (B, S, 2 * enc_hid),
                                        dtype=jnp.float32)
    # Mask: first example full length, second padded after 5 tokens.
    lengths = jnp.array([S, 5])
    mask = (jnp.arange(S)[None, :] < lengths[:, None])  # (B, S) bool

    # Deterministic "Linear" params (U(-1/sqrt(fan_in), 1/sqrt(fan_in)), like torch).
    bound_attn = 1.0 / jnp.sqrt(jnp.float32(in_feat))
    w_attn = jax.random.uniform(k_w, (dec_hid, in_feat), jnp.float32,
                                -bound_attn, bound_attn)
    b_attn = jax.random.uniform(k_b, (dec_hid,), jnp.float32,
                                -bound_attn, bound_attn)
    bound_v = 1.0 / jnp.sqrt(jnp.float32(dec_hid))
    v = jax.random.uniform(k_v, (1, dec_hid), jnp.float32, -bound_v, bound_v)

    out = bahdanau_attention(hidden, encoder_outputs, mask, w_attn, b_attn, v)
    out = jax.block_until_ready(out)

    ref = _reference(hidden, encoder_outputs, mask, w_attn, b_attn, v)
    assert out.shape == (B, S)
    # Tolerances: bf16 MXU inputs (f32 accumulation) + EUP approximate
    # reciprocal in the softmax denominator; probabilities match well within
    # this bound, rows sum to 1 within ~1e-3.
    assert jnp.allclose(out, ref, atol=2e-2, rtol=2e-2)
    assert jnp.allclose(jnp.sum(out, axis=1), 1.0, atol=2e-3)

    print("KERNEL_OK")
</pallas_src>

<mosaic_0001>
module attributes {stable_mosaic.version = 11 : i64} {
  func.func @_attention_kernel(%arg0: i32, %arg1: memref<2x128xf32, #tpu.memory_space<vmem>>, %arg2: memref<16x32xf32, #tpu.memory_space<vmem>>, %arg3: memref<2x8xbf16, #tpu.memory_space<vmem>>, %arg4: memref<32x128xbf16, #tpu.memory_space<vmem>>, %arg5: memref<1x128xf32, #tpu.memory_space<vmem>>, %arg6: memref<2x8xf32, #tpu.memory_space<vmem>>) attributes {dimension_semantics = [#tpu.dimension_semantics<parallel>], iteration_bounds = array<i64: 1>, scalar_prefetch = 0 : i64, scratch_operands = 0 : i64, tpu.core_type = #tpu.core_type<tc>, window_params = [{transform_indices = @transform_0, window_bounds = array<i64: 2, 128>}, {transform_indices = @transform_1, window_bounds = array<i64: 16, 32>}, {transform_indices = @transform_2, window_bounds = array<i64: 2, 8>}, {pipeline_mode = #tpu.pipeline_mode<synchronous>, transform_indices = @transform_3, window_bounds = array<i64: 32, 128>}, {pipeline_mode = #tpu.pipeline_mode<synchronous>, transform_indices = @transform_4, window_bounds = array<i64: 1, 128>}, {transform_indices = @transform_5, window_bounds = array<i64: 2, 8>}]} {
    %c0 = arith.constant 0 : index
    %c0_0 = arith.constant 0 : index
    %0 = vector.load %arg2[%c0, %c0_0] : memref<16x32xf32, #tpu.memory_space<vmem>>, vector<16x32xf32>
    %1 = arith.truncf %0 : vector<16x32xf32> to vector<16x32xbf16>
    %c0_1 = arith.constant 0 : index
    %c0_2 = arith.constant 0 : index
    %2 = vector.load %arg4[%c0_1, %c0_2] : memref<32x128xbf16, #tpu.memory_space<vmem>>, vector<32x128xbf16>
    %cst = arith.constant dense<0.000000e+00> : vector<16x128xf32>
    %3 = tpu.matmul %1, %2, %cst {dimension_numbers = #tpu.dot_dimension_numbers<[1], [0], [0], [1], [0, 0, 1, 1], [], []>} : vector<16x32xbf16>, vector<32x128xbf16>, vector<16x128xf32> -> vector<16x128xf32>
    %4 = vector.shape_cast %3 : vector<16x128xf32> to vector<2x8x128xf32>
    %c0_3 = arith.constant 0 : index
    %c0_4 = arith.constant 0 : index
    %5 = vector.load %arg1[%c0_3, %c0_4] : memref<2x128xf32, #tpu.memory_space<vmem>>, vector<2x128xf32>
    %6 = vector.shape_cast %5 : vector<2x128xf32> to vector<2x1x128xf32>
    %7 = vector.broadcast %6 : vector<2x1x128xf32> to vector<2x8x128xf32>
    %8 = arith.addf %4, %7 : vector<2x8x128xf32>
    %9 = math.tanh %8 : vector<2x8x128xf32>
    %c0_5 = arith.constant 0 : index
    %c0_6 = arith.constant 0 : index
    %10 = vector.load %arg5[%c0_5, %c0_6] : memref<1x128xf32, #tpu.memory_space<vmem>>, vector<1x128xf32>
    %11 = vector.shape_cast %10 : vector<1x128xf32> to vector<1x1x128xf32>
    %12 = vector.broadcast %11 : vector<1x1x128xf32> to vector<2x8x128xf32>
    %13 = arith.mulf %9, %12 : vector<2x8x128xf32>
    %cst_7 = arith.constant dense<0.000000e+00> : vector<2x8xf32>
    %14 = vector.multi_reduction <add>, %13, %cst_7 [2] : vector<2x8x128xf32> to vector<2x8xf32>
    %c0_8 = arith.constant 0 : index
    %c0_9 = arith.constant 0 : index
    %15 = vector.load %arg3[%c0_8, %c0_9] : memref<2x8xbf16, #tpu.memory_space<vmem>>, vector<2x8xbf16>
    %16 = arith.extf %15 : vector<2x8xbf16> to vector<2x8xf32>
    %cst_10 = arith.constant 0.000000e+00 : f32
    %17 = vector.broadcast %cst_10 : f32 to vector<2x8xf32>
    %18 = arith.cmpf oeq, %16, %17 : vector<2x8xf32>
    %cst_11 = arith.constant -1.000000e+10 : f32
    %19 = vector.broadcast %cst_11 : f32 to vector<2x8xf32>
    %20 = arith.select %18, %19, %14 : vector<2x8xi1>, vector<2x8xf32>
    %cst_12 = arith.constant dense<0xFF800000> : vector<2xf32>
    %21 = vector.multi_reduction <maximumf>, %20, %cst_12 [1] : vector<2x8xf32> to vector<2xf32>
    %22 = vector.shape_cast %21 : vector<2xf32> to vector<2x1xf32>
    %23 = vector.broadcast %22 : vector<2x1xf32> to vector<2x8xf32>
    %24 = arith.subf %20, %23 : vector<2x8xf32>
    %25 = math.exp %24 : vector<2x8xf32>
    %cst_13 = arith.constant dense<0.000000e+00> : vector<2xf32>
    %26 = vector.multi_reduction <add>, %25, %cst_13 [1] : vector<2x8xf32> to vector<2xf32>
    %27 = vector.shape_cast %26 : vector<2xf32> to vector<2x1xf32>
    %28 = tpu.reciprocal %27 {approx = true} : vector<2x1xf32> -> vector<2x1xf32>
    %29 = vector.broadcast %28 : vector<2x1xf32> to vector<2x8xf32>
    %30 = arith.mulf %25, %29 : vector<2x8xf32>
    %c0_14 = arith.constant 0 : index
    %c0_15 = arith.constant 0 : index
    %31 = vector.load %arg6[%c0_14, %c0_15] : memref<2x8xf32, #tpu.memory_space<vmem>>, vector<2x8xf32>
    tpu.vector_store %arg6[%c0_14, %c0_15], %30 {strides = array<i32>} : memref<2x8xf32, #tpu.memory_space<vmem>>, vector<2x8xf32>,
    return
  }
  func.func @transform_0(%arg0: i32) -> (i32, i32) {
    %c0_i32 = arith.constant 0 : i32
    %c0_i32_0 = arith.constant 0 : i32
    return %arg0, %c0_i32 : i32, i32
  }
  func.func @transform_1(%arg0: i32) -> (i32, i32) {
    %c0_i32 = arith.constant 0 : i32
    %c0_i32_0 = arith.constant 0 : i32
    return %arg0, %c0_i32 : i32, i32
  }
  func.func @transform_2(%arg0: i32) -> (i32, i32) {
    %c0_i32 = arith.constant 0 : i32
    %c0_i32_0 = arith.constant 0 : i32
    return %arg0, %c0_i32 : i32, i32
  }
  func.func @transform_3(%arg0: i32) -> (i32, i32) {
    %c0_i32 = arith.constant 0 : i32
    %c0_i32_0 = arith.constant 0 : i32
    %c0_i32_1 = arith.constant 0 : i32
    return %c0_i32, %c0_i32_0 : i32, i32
  }
  func.func @transform_4(%arg0: i32) -> (i32, i32) {
    %c0_i32 = arith.constant 0 : i32
    %c0_i32_0 = arith.constant 0 : i32
    %c0_i32_1 = arith.constant 0 : i32
    return %c0_i32, %c0_i32_0 : i32, i32
  }
  func.func @transform_5(%arg0: i32) -> (i32, i32) {
    %c0_i32 = arith.constant 0 : i32
    %c0_i32_0 = arith.constant 0 : i32
    return %arg0, %c0_i32 : i32, i32
  }
}

</mosaic_0001>

<bundles_post_ra>
// kernel: tpu_custom_call.1
= control target key start
LH: loop header
LB: loop body
LE: loop exit
PB: predicated region body
PF: predicated region fallthrough
CT: control target
= control target key end

     0   :  { %10 = vsyncpa [#allocation3], 0  ;;  %s582_s0 = inlined_call_operand.hbm [shape: f32[2,128], index: 0, kind: input, shape index: {}]   ;;  %s583_s1 = inlined_call_operand.hbm [shape: f32[16,32], index: 1, kind: input, shape index: {}]   ;;  %s584_s2 = inlined_call_operand.vmem [shape: bf16[2,8], index: 2, kind: input, shape index: {}]   ;;  %s585_s3 = inlined_call_operand.hbm [shape: bf16[32,128], index: 3, kind: input, shape index: {}]   ;;  %s586_s4 = inlined_call_operand.vmem [shape: f32[1,128], index: 4, kind: input, shape index: {}]   ;;  %s587_s5 = inlined_call_operand.hbm [shape: f32[2,8], index: 5, kind: output, shape index: {}]  }
   0x1   :  { %11 = vsyncpa [#allocation6], 0 }
   0x2   :  { %12 = vsyncpa [#allocation4], 0  ;;  %s466_s18 = smov [#allocation5]   ;;  %s372_s22 = scalar_lea.hbm %s583_s1, 256 }
   0x3   :  { %s28_s19 = sshll.u32 %s466_s18, 4  ;;  %p373_p0 = scmp.ne.s32.totalorder %s583_s1, %s372_s22  ;;  %s29_s19 = int_to_ptr.vmem [resolvable:$true] %s28_s19 }
   0x4   :  { %p376_p1 = scmp.lt.u32.totalorder %s372_s22, %s583_s1 }
   0x6   :  { %p378_p2 = pnand %p376_p1, %p373_p0 }
   0x8   :  { %381 = shalt.err (!%p378_p2)
}
   0x9   :  { %s382_s27 = scalar_lea.vmem %s29_s19, 256  ;;  %p387_p4 = scmp.lt.s32.totalorder %s29_s19, %s29_s19 }
   0xa   :  { %p383_p3 = scmp.ne.s32.totalorder %s29_s19, %s382_s27  ;;  %p388_p5 = scmp.lt.s32.totalorder %s382_s27, %s382_s27 }
   0xc   :  { %p389_p6 = por %p388_p5, %p387_p4 }
   0xe   :  { %p390_p7 = pnand %p389_p6, %p383_p3 }
  0x10   :  { %393 = shalt.err (!%p390_p7)
}
  0x11   :  { %s467_s28 = smov 128   ;;  %s468_s29 = smov 8  }
  0x12   :  { %34 = dma.hbm_to_vmem [thread:$0]  %s583_s1, 256, %s29_s19, [#allocation6], %s467_s28, %s467_s28, %s468_s29  }
  0x13   :  { %s469_s7 = smov [#allocation2]   ;;  %s470_s9 = smov [#allocation7]  }
  0x14   :  { %s19_s8 = sshll.u32 %s469_s7, 4  ;;  %s42_s10 = sshll.u32 %s470_s9, 4  ;;  %s20_s8 = int_to_ptr.vmem [resolvable:$true] %s19_s8  ;;  %s43_s10 = int_to_ptr.vmem [resolvable:$true] %s42_s10 }
  0x15   :  { %s394_s13 = scalar_lea.hbm %s582_s0, 32 }
  0x16   :  { %p395_p8 = scmp.ne.s32.totalorder %s582_s0, %s394_s13  ;;  %p398_p9 = scmp.lt.u32.totalorder %s394_s13, %s582_s0 }
  0x18   :  { %p400_p10 = pnand %p398_p9, %p395_p8 }
  0x1a   :  { %403 = shalt.err (!%p400_p10)
}
  0x1b   :  { %s404_s1 = scalar_lea.vmem %s20_s8, 32  ;;  %p409_p12 = scmp.lt.s32.totalorder %s20_s8, %s20_s8 }
  0x1c   :  { %p405_p11 = scmp.ne.s32.totalorder %s20_s8, %s404_s1  ;;  %p410_p13 = scmp.lt.s32.totalorder %s404_s1, %s404_s1 }
  0x1e   :  { %p411_p0 = por %p410_p13, %p409_p12 }
  0x20   :  { %p412_p1 = pnand %p411_p0, %p405_p11 }
  0x22   :  { %415 = shalt.err (!%p412_p1)
}
  0x23   :  { %22 = dma.hbm_to_vmem [thread:$0]  %s582_s0, 32, %s20_s8, [#allocation3]  }
  0x24   :  { %s416_s22 = scalar_lea.hbm %s585_s3, 256 }
  0x25   :  { %p417_p2 = scmp.ne.s32.totalorder %s585_s3, %s416_s22  ;;  %p420_p3 = scmp.lt.u32.totalorder %s416_s22, %s585_s3 }
  0x27   :  { %p422_p4 = pnand %p420_p3, %p417_p2 }
  0x29   :  { %425 = shalt.err (!%p422_p4)
}
  0x2a   :  { %s426_s27 = scalar_lea.vmem %s43_s10, 256  ;;  %p431_p6 = scmp.lt.s32.totalorder %s43_s10, %s43_s10 }
  0x2b   :  { %p427_p5 = scmp.ne.s32.totalorder %s43_s10, %s426_s27  ;;  %p432_p7 = scmp.lt.s32.totalorder %s426_s27, %s426_s27 }
  0x2d   :  { %p433_p8 = por %p432_p7, %p431_p6 }
  0x2f   :  { %p434_p9 = pnand %p433_p8, %p427_p5 }
  0x31   :  { %437 = shalt.err (!%p434_p9)
}
  0x32   :  { %s471_s0 = smov 64   ;;  %s472_s28 = smov 4  }
  0x33   :  { %48 = dma.hbm_to_vmem [thread:$0]  %s585_s3, 256, %s43_s10, [#allocation6], %s471_s0, %s471_s0, %s472_s28  }
  0x34   :  { %460 = dma.done.wait [#allocation3], 32  }
  0x35   :  { %461 = vsyncadd [#allocation3], 4294967264 }
  0x36   :  { %462 = dma.done.wait [#allocation6], 512  }
  0x37   :  { %463 = vsyncadd [#allocation6], 4294966784  ;;  %v473_v0 = vmov 0.0   ;;  %vm474_vm0 = vmmov 0   ;;  %v362_v1 = vld [vmem:[#allocation7] sm:$0xff]   ;;  %v363_v2 = vld [vmem:[#allocation7 + $0x8] sm:$0xff]   ;;  %v138_v8 = vlaneseq }
  0x38   :  { %335 = vmatprep.subr.bf16.mxu0 %v473_v0  ;;  %339 = vmatprep.mubr.msk.bf16.mxu0 %vm474_vm0, %v473_v0  ;;  %v61_v3 = vld [vmem:[#allocation5] sm:$0xff]  ;;  %v62_v4 = vld [vmem:[#allocation5 + $0x8] sm:$0xff]  ;;  %vm80_vm1 = vcmask 261120   ;;  %v475_v6 = vmov 1966171168   ;;  %v476_v30 = vmov 0  }
  0x39   :  { %336 = vmatpush3.bf16.msra.mxu0 %v362_v1  ;;  %v63_v5 = vpack.c.bf16 %v62_v4, %v61_v3  ;;  %v136_v7 = vunpack.c.l.s4 %v475_v6  ;;  %v550_v10 = vshrl.u32 %v138_v8, 7  ;;  %v330_v11 = vld.sshfl [vmem:[#allocation2] sm:$0x11 pattern:$0x75316420]  ;;  %360 = vset.pattern.permute.xlu1 %v476_v30  ;;  %vm287_vm2 = vcmask 1041409  }
  0x3a   :  { %337 = vmatprep.subr.bf16.mxu0 %v473_v0  ;;  %v134_v13 = vcombine.high %v330_v11, %v330_v11  ;;  %v331_v25 = vld [vmem:[%s586_s4] ss:$0 sm:$0xff]  ;;  %361 = vset.pattern.permute.xlu0 %v476_v30  ;;  %v477_v31 = vmov 269488144   ;;  %v478_v33 = vmov 842150450  }
  0x3b   :  { %v137_v9 = vunpack.c.0.s8 %v136_v7  ;;  %v151_v15 = vsub.s32 0, %v550_v10  ;;  %v182_v32 = vunpack.c.l.s4 %v477_v31  ;;  %v189_v34 = vunpack.c.l.s4 %v478_v33 }
  0x3c   :  { %v479_v35 = vmov 1414812756   ;;  %v480_v37 = vmov 1987475062   ;;  %v481_v43 = vmov 1983009808  }
  0x3d   :  { %338 = vmatpush3.bf16.msra.mxu0 %v363_v2  ;;  %v140_v12 = vsub.s32 %v137_v9, %v550_v10  ;;  %v196_v36 = vunpack.c.l.s4 %v479_v35  ;;  %v203_v38 = vunpack.c.l.s4 %v480_v37  ;;  %v183_v39 = vunpack.c.0.s8 %v182_v32 }
  0x3e   :  { %v190_v40 = vunpack.c.0.s8 %v189_v34  ;;  %v240_v44 = vunpack.c.l.s4 %v481_v43  ;;  %v278_v7 = vand.u32 127, %v138_v8  ;;  %vm298_vm4 = vcmask 58368  }
  0x3f   :  { %v141_v14 = vrot.slane %v330_v11, %v140_v12  ;;  %v148_v16 = vrot.slane %v134_v13, %v140_v12  ;;  %v197_v41 = vunpack.c.0.s8 %v196_v36  ;;  %v204_v42 = vunpack.c.0.s8 %v203_v38  ;;  %v176_v11 = vld [vmem:[%s584_s2] sm:$0x1]  ;;  %s482_s2 = smov [#allocation8]  }
  0x40   :  { %340 = vmatmul.mubr.msk.bf16.vlgmr.msra.gmra.mrb[0].mxu0 %vm80_vm1, %v63_v5  ;;  %v186_v45 = vsub.s32 %v183_v39, %v550_v10  ;;  %v193_v46 = vsub.s32 %v190_v40, %v550_v10  ;;  %v241_v49 = vunpack.c.0.s8 %v240_v44  ;;  %v281_v12 = vsub.s32 %v278_v7, %v550_v10  ;;  %s317_s8 = sshll.u32 %s482_s2, 4  ;;  %s318_s8 = int_to_ptr.vmem [resolvable:$true] %s317_s8 }
  0x41   :  { %v152_v17 = vrot.slane %v141_v14, %v151_v15  ;;  %v156_v18 = vrot.slane %v148_v16, %v151_v15  ;;  %v200_v47 = vsub.s32 %v197_v41, %v550_v10  ;;  %v207_v48 = vsub.s32 %v204_v42, %v550_v10  ;;  %s438_s9 = scalar_lea.vmem %s318_s8, 32  ;;  %p443_p11 = scmp.lt.s32.totalorder %s318_s8, %s318_s8 }
  0x42   :  { %v244_v55 = vsub.s32 %v241_v49, %v550_v10  ;;  %v177_v13 = vunpack.c.l.bf16 %v176_v11  ;;  %p439_p10 = scmp.ne.s32.totalorder %s318_s8, %s438_s9  ;;  %p444_p12 = scmp.lt.s32.totalorder %s438_s9, %s438_s9 }
  0x44   :  { %vm178_vm3 = vcmp.eq.f32.partialorder %v177_v13, 0.0  ;;  %p445_p13 = por %p444_p12, %p443_p11 }
  0x46   :  { %p446_p0 = pnand %p445_p13, %p439_p10 }
 0x113   :  { %v118_v19 = vpop.f32.mrb[0].mxu0 }
 0x114   :  { %v159_v20 = vadd.f32 %v152_v17, %v118_v19  ;;  %v341_v21 = vpop.f32.mrb[1].mxu0 }
 0x115   :  { %v121_v22 = vpop.f32.mrb[2].mxu0 }
 0x116   :  { %364 = vtanh.f32 %v159_v20  ;;  %v160_v23 = vadd.f32 %v156_v18, %v121_v22  ;;  %v342_v24 = vpop.f32.mrb[3].mxu0 }
 0x118   :  { %366 = vtanh.f32 %v160_v23 }
 0x120   :  { %v365_v26 = vpop.eup %364 }
 0x121   :  { %v170_v27 = vmul.f32 %v365_v26, %v331_v25 }
 0x122   :  { %v367_v28 = vpop.eup %366 }
 0x123   :  { %172 = vadd.xlane.f32.xlu0 %v170_v27  ;;  %v171_v29 = vmul.f32 %v367_v28, %v331_v25 }
 0x127   :  { %174 = vadd.xlane.f32.xlu0 %v171_v29 }
 0x1b0   :  { %v173_v50 = vpop.xlane.xlu0 %172 }
 0x1b1   :  { %v187_v51 = vrot.slane %v173_v50, %v186_v45  ;;  %v194_v52 = vrot.slane %v173_v50, %v193_v46  ;;  %v201_v53 = vrot.slane %v173_v50, %v200_v47  ;;  %v208_v54 = vrot.slane %v173_v50, %v207_v48 }
 0x1b3   :  { %v237_v56 = vcombine.low %v187_v51, %v194_v52  ;;  %v238_v57 = vcombine.low %v201_v53, %v208_v54 }
 0x1b4   :  { %v175_v58 = vpop.xlane.xlu0 %174 }
 0x1b5   :  { %v215_v59 = vrot.slane %v175_v58, %v186_v45  ;;  %v222_v60 = vrot.slane %v175_v58, %v193_v46  ;;  %v229_v61 = vrot.slane %v175_v58, %v200_v47  ;;  %v236_v62 = vrot.slane %v175_v58, %v207_v48 }
 0x1b6   :  { %v245_v63 = vrot.slane %v237_v56, %v244_v55  ;;  %v252_v0 = vrot.slane %v238_v57, %v244_v55 }
 0x1b7   :  { %v254_v1 = vcombine.low %v215_v59, %v222_v60  ;;  %v255_v2 = vcombine.low %v229_v61, %v236_v62 }
 0x1b8   :  { %v253_v3 = vcombine.low %v245_v63, %v252_v0 }
 0x1b9   :  { %v262_v4 = vrot.slane %v254_v1, %v244_v55  ;;  %v269_v5 = vrot.slane %v255_v2, %v244_v55 }
 0x1ba   :  { %272 = vperm.xlu1 %360, %v253_v3  }
 0x1bb   :  { %v270_v6 = vcombine.low %v262_v4, %v269_v5 }
 0x1be   :  { %275 = vperm.xlu1 %360, %v270_v6  }
 0x239   :  { %v273_v9 = vpop.permute.xlu1 %272 }
 0x23a   :  { %v282_v15 = vrot.slane %v273_v9, %v281_v12 }
 0x23d   :  { %v276_v14 = vpop.permute.xlu1 %275 }
 0x23e   :  { %v286_v16 = vrot.slane %v276_v14, %v281_v12 }
 0x240   :  { %v288_v17 = vsel %vm287_vm2, %v286_v16, %v282_v15 }
 0x241   :  { %v295_v18 = vrot.slane %v288_v17, %v244_v55 }
 0x243   :  { %v297_v19 = vsel %vm178_vm3, -1e+10, %v295_v18 }
 0x244   :  { %v299_v20 = vsel %vm298_vm4, %v297_v19, -inf }
 0x245   :  { %300 = vmax.xlane.f32.xlu0 %v299_v20 }
 0x2d2   :  { %v301_v8 = vpop.xlane.xlu0 %300 }
 0x2d3   :  { %v302_v21 = vsub.f32 %v297_v19, %v301_v8 }
 0x2d5   :  { %v303_v22 = vmul.f32 1.442695, %v302_v21 }
 0x2d7   :  { %368 = vpow2.f32 %v303_v22 }
 0x2e1   :  { %v369_v23 = vpop.eup %368 }
 0x2e2   :  { %v305_v10 = vsel %vm298_vm4, %v369_v23, 0.0 }
 0x2e3   :  { %306 = vadd.xlane.f32.xlu1 %v305_v10 }
 0x370   :  { %v307_v24 = vpop.xlane.xlu1 %306 }
 0x371   :  { %370 = vrcp.f32 %v307_v24 }
 0x37b   :  { %v371_v25 = vpop.eup %370 }
 0x37c   :  { %v309_v26 = vmul.f32 %v371_v25, %v369_v23 }
 0x37e   :  { %310 = vst.msk [vmem:[#allocation8] sm:$0x3] %vm298_vm4, %v309_v26 }
 0x37f   :  { %449 = shalt.err (!%p446_p0)
}
 0x380   :  { %s450_s12 = scalar_lea.hbm %s587_s5, 32 }
 0x381   :  { %p451_p1 = scmp.ne.s32.totalorder %s587_s5, %s450_s12  ;;  %p454_p2 = scmp.lt.u32.totalorder %s450_s12, %s587_s5 }
 0x383   :  { %p456_p3 = pnand %p454_p2, %p451_p1 }
 0x385   :  { %459 = shalt.err (!%p456_p3)
}
 0x386   :  { %320 = dma.vmem_to_hbm [thread:$0]  %s318_s8, 32, %s587_s5, [#allocation4]  }
 0x387   :  { %464 = dma.done.wait [#allocation4], 32  }
 0x388   :  { %465 = vsyncadd [#allocation4], 4294967264 }
 0x389   :  { %324 = vsyncpa [#allocation3], 1 }
 0x38a   :  { %325 = vsyncpa [#allocation6], 1 }
 0x38b   :  { %326 = vsyncpa [#allocation4], 1 }

</bundles_post_ra>
